<compile_context>
chip_gen: v5e
topology: v5e:2x2
jax: 0.10.0
libtpu: 0.0.40
codegen_flags: <defaults>
</compile_context>

<pallas_src>
import functools

import jax
import jax.numpy as jnp
import numpy as np
from jax import lax
from jax.experimental import pallas as pl
from jax.experimental.pallas import tpu as pltpu


# --------------------------------------------------------------------------- #
# Wrapper-side parameter repacking (tiny, plain XLA, runs under the same jit).
# --------------------------------------------------------------------------- #
def _banded_weights(w_hwio, w_in, w_out, offset):
    """Banded matmul weights for a stride-1 conv along W, zero-pad folded in.

    w_hwio: (KH, KW, Cin, Cout).  Returns M of shape (KH*w_in*Cin, w_out*Cout):
        M[kh*w_in*Cin + wi*Cin + ci, wo*Cout + co]
            = w_hwio[kh, wi - wo + offset, ci, co]   (0 if kw out of [0,KW))
    so that  conv[row, wo*Cout+co] = X[row] @ M  where X[row] concatenates the
    KH H-shifted input rows (each w_in*Cin lanes) along K.  No materialized
    zero padding along W is needed.
    """
    kh_, kw_, cin, cout = w_hwio.shape
    wi = jnp.arange(w_in)[:, None, None]
    wo = jnp.arange(w_out)[None, :, None]
    kw = jnp.arange(kw_)[None, None, :]
    onehot = (wi == wo + kw - offset).astype(w_hwio.dtype)      # (w_in, w_out, KW)
    band = jnp.einsum("iok,hkcd->hicod", onehot, w_hwio)        # (KH,w_in,Cin,w_out,Cout)
    return band.reshape(kh_ * w_in * cin, w_out * cout)


def _parity_perm(w_out, cout):
    """Column permutation: even spatial columns first, odd second (per c-block).

    Applying it to the banded weight columns makes MaxPool along W a simple
    elementwise max of the two 128-lane halves of the conv output.
    """
    order = np.concatenate([np.arange(0, w_out, 2), np.arange(1, w_out, 2)])
    return (order[:, None] * cout + np.arange(cout)[None, :]).reshape(-1)


# --------------------------------------------------------------------------- #
# The fused kernel: one grid step == `bsz` images, everything lane-dense.
# --------------------------------------------------------------------------- #
def _prenet_kernel(xp_ref, w1_ref, b1_ref, w2_ref, b2_ref, o_ref,
                   pool1_ref, pool2_ref, *, bsz, h, w, c1, c2):
    f32, bf16 = jnp.float32, jnp.bfloat16
    hm, hq = h // 2, h // 4
    wm, wq = w // 2, w // 4
    half1 = wm * c1          # 128 for w=16,c1=16
    half2 = wq * c2          # 128 for w=16,c2=32

    # ---- layer 1: Conv2d(1->c1, k=5, s=1, p=2) + bias + ReLU ----------------
    # Single MXU matmul: the 5 kh-shifted input row-slabs are concatenated
    # along K (K = 5*w).  Input is H-padded (by the wrapper); W-padding is
    # folded into the banded weights.
    xf = xp_ref[...]                                            # (B, h+4, w) f32
    x1 = jnp.concatenate(
        [xf[:, kh:kh + h, :].reshape(bsz * h, w) for kh in range(5)],
        axis=-1).astype(bf16)                                   # (B*h, 5*w)
    act1 = jnp.maximum(
        jnp.dot(x1, w1_ref[...], preferred_element_type=f32) + b1_ref[...],
        0.0)                                                    # (B*h, w*c1) f32

    # ---- MaxPool2d(2) of layer 1 --------------------------------------------
    # W direction: conv1's output columns are parity-split (even W columns in
    # the first 128 lanes, odd in the second — folded into w1_ref), so the
    # pool is an exact half-slab max.  H direction: consecutive-row pairs via
    # stride-2 sublane reads from a VMEM scratch ref.
    pool1_ref[...] = jnp.maximum(act1[:, :half1], act1[:, half1:])   # (B*h, 128)
    pooled1 = jnp.maximum(pool1_ref[pl.ds(0, bsz * hm, stride=2), :],
                          pool1_ref[pl.ds(1, bsz * hm, stride=2), :])  # (B*hm, 128)

    # ---- layer 2: Conv2d(c1->c2, k=5, s=1, p=2) + bias + ReLU ---------------
    # Per-image zero rows (the conv's H padding) are added on the value, then
    # the 5 kh-windows are concatenated along K (K = 5*wm*c1 = 640).
    zrows = jnp.zeros((bsz, 2, half1), f32)
    padded = jnp.concatenate(
        [zrows, pooled1.reshape(bsz, hm, half1), zrows], axis=1)  # (B, hm+4, 128)
    x2 = jnp.concatenate(
        [padded[:, kh:kh + hm, :].reshape(bsz * hm, half1) for kh in range(5)],
        axis=-1).astype(bf16)                                     # (B*hm, 5*wm*c1)
    act2 = jnp.maximum(
        jnp.dot(x2, w2_ref[...], preferred_element_type=f32) + b2_ref[...],
        0.0)                                                      # (B*hm, wm*c2) f32

    # ---- MaxPool2d(2) of layer 2 -> lane/tile-dense output slab -------------
    pool2_ref[...] = jnp.maximum(act2[:, :half2], act2[:, half2:])  # (B*hm, 128)
    o_ref[...] = jnp.maximum(pool2_ref[pl.ds(0, bsz * hq, stride=2), :],
                             pool2_ref[pl.ds(1, bsz * hq, stride=2), :])


@jax.jit
def cnn_prenet_forward(x_nchw, w1, b1, w2, b2):
    """CNNPreNet.forward: NCHW input, PyTorch OIHW/(Cout,) params, NCHW output."""
    n, cin, h, w = x_nchw.shape
    assert cin == 1 and h % 4 == 0 and w % 4 == 0, (cin, h, w)
    c1, c2 = w1.shape[0], w2.shape[0]
    hm, hq, wm, wq = h // 2, h // 4, w // 2, w // 4

    # Images per grid step: big enough that conv matmuls have M ~ 64-128 rows
    # and the flattened output block is a full (>=8, 128) tile; halved when it
    # would leave a single grid step (so v7x's two TensorCores both get work).
    bsz = min(8, n)
    if n // bsz < 2 and bsz >= 4 and bsz % 2 == 0:
        bsz //= 2
    npad = -(-n // bsz) * bsz

    # Banded conv weights (bf16 MXU operands) with the W zero-padding folded in
    # and output columns parity-permuted (even W cols first) so W-MaxPool is a
    # half-slab max.  Biases are channel-tiled (permutation preserves channel
    # order inside each c-block, so no bias permutation is needed).
    w1_hwio = jnp.transpose(w1, (2, 3, 1, 0)).astype(jnp.float32)   # (5,5,1,c1)
    w2_hwio = jnp.transpose(w2, (2, 3, 1, 0)).astype(jnp.float32)   # (5,5,c1,c2)
    w1m = _banded_weights(w1_hwio, w, w, 2)[:, _parity_perm(w, c1)]
    w2m = _banded_weights(w2_hwio, wm, wm, 2)[:, _parity_perm(wm, c2)]
    w1m = w1m.astype(jnp.bfloat16)                                  # (5*w,     w*c1)
    w2m = w2m.astype(jnp.bfloat16)                                  # (5*wm*c1, wm*c2)
    b1t = jnp.tile(b1.astype(jnp.float32), w)[None, :]              # (1, w*c1)
    b2t = jnp.tile(b2.astype(jnp.float32), wm)[None, :]             # (1, wm*c2)

    # H-padded single-channel input, (npad, h+4, w); batch padded to npad.
    xp = jnp.pad(x_nchw[:, 0, :, :].astype(jnp.float32),
                 ((0, npad - n), (2, 2), (0, 0)))

    kernel = functools.partial(_prenet_kernel, bsz=bsz, h=h, w=w, c1=c1, c2=c2)

    out_flat = pl.pallas_call(
        kernel,
        out_shape=jax.ShapeDtypeStruct((npad * hq, wq * c2), jnp.float32),
        grid=(npad // bsz,),
        in_specs=[
            pl.BlockSpec((bsz, h + 4, w), lambda i: (i, 0, 0)),
            pl.BlockSpec(w1m.shape, lambda i: (0, 0)),
            pl.BlockSpec(b1t.shape, lambda i: (0, 0)),
            pl.BlockSpec(w2m.shape, lambda i: (0, 0)),
            pl.BlockSpec(b2t.shape, lambda i: (0, 0)),
        ],
        out_specs=pl.BlockSpec((bsz * hq, wq * c2), lambda i: (i, 0)),
        scratch_shapes=[
            pltpu.VMEM((bsz * h, wm * c1), jnp.float32),    # pool-1 H staging
            pltpu.VMEM((bsz * hm, wq * c2), jnp.float32),   # pool-2 H staging
        ],
        compiler_params=pltpu.CompilerParams(
            dimension_semantics=("parallel",)),
    )(xp, w1m, b1t, w2m, b2t)

    # (npad*H/4, (W/4)*c2) -> NCHW (n, c2, H/4, W/4)
    out = out_flat[:n * hq].reshape(n, hq, wq, c2)
    return jnp.transpose(out, (0, 3, 1, 2))


def _reference_forward(x, w1, b1, w2, b2):
    """Plain-JAX f32 reference matching the PyTorch module semantics."""
    def block(x, w, b):
        y = lax.conv_general_dilated(
            x, w, window_strides=(1, 1), padding=((2, 2), (2, 2)),
            dimension_numbers=("NCHW", "OIHW", "NCHW"),
            precision=lax.Precision.HIGHEST)
        y = jnp.maximum(y + b.reshape(1, -1, 1, 1), 0.0)
        return lax.reduce_window(y, -jnp.inf, lax.max,
                                 (1, 1, 2, 2), (1, 1, 2, 2), "VALID")
    return block(block(x, w1, b1), w2, b2)


if __name__ == "__main__":
    key = jax.random.PRNGKey(0)
    k1, k2, k3, k4, kx = jax.random.split(key, 5)

    # Deterministic synthetic parameters (PyTorch shapes: OIHW / (Cout,)).
    w1 = 0.10 * jax.random.normal(k1, (16, 1, 5, 5), jnp.float32)
    b1 = 0.10 * jax.random.normal(k2, (16,), jnp.float32)
    w2 = 0.05 * jax.random.normal(k3, (32, 16, 5, 5), jnp.float32)
    b2 = 0.10 * jax.random.normal(k4, (32,), jnp.float32)

    # Small NCHW input consistent with the module (1 input channel).
    x = jax.random.normal(kx, (2, 1, 16, 16), jnp.float32)

    out = jax.block_until_ready(cnn_prenet_forward(x, w1, b1, w2, b2))
    ref = jax.block_until_ready(_reference_forward(x, w1, b1, w2, b2))

    assert out.shape == (2, 32, 4, 4), out.shape
    # Conv matmuls use native bf16 MXU operands (f32 accumulation); all pooling
    # and padding paths are exact f32, so error is bf16-rounding only (~3e-3).
    err = float(jnp.max(jnp.abs(out - ref)))
    assert jnp.allclose(out, ref, atol=1e-2, rtol=1e-2), err
    print("KERNEL_OK")
</pallas_src>

<mosaic_0001>
module attributes {stable_mosaic.version = 11 : i64} {
  func.func @_prenet_kernel(%arg0: i32, %arg1: memref<2x20x16xf32, #tpu.memory_space<vmem>>, %arg2: memref<80x256xbf16, #tpu.memory_space<vmem>>, %arg3: memref<1x256xf32, #tpu.memory_space<vmem>>, %arg4: memref<640x256xbf16, #tpu.memory_space<vmem>>, %arg5: memref<1x256xf32, #tpu.memory_space<vmem>>, %arg6: memref<8x128xf32, #tpu.memory_space<vmem>>, %arg7: memref<32x128xf32, #tpu.memory_space<vmem>>, %arg8: memref<16x128xf32, #tpu.memory_space<vmem>>) attributes {dimension_semantics = [#tpu.dimension_semantics<parallel>], iteration_bounds = array<i64: 1>, scalar_prefetch = 0 : i64, scratch_operands = 2 : i64, tpu.core_type = #tpu.core_type<tc>, window_params = [{transform_indices = @transform_0, window_bounds = array<i64: 2, 20, 16>}, {pipeline_mode = #tpu.pipeline_mode<synchronous>, transform_indices = @transform_1, window_bounds = array<i64: 80, 256>}, {pipeline_mode = #tpu.pipeline_mode<synchronous>, transform_indices = @transform_2, window_bounds = array<i64: 1, 256>}, {pipeline_mode = #tpu.pipeline_mode<synchronous>, transform_indices = @transform_3, window_bounds = array<i64: 640, 256>}, {pipeline_mode = #tpu.pipeline_mode<synchronous>, transform_indices = @transform_4, window_bounds = array<i64: 1, 256>}, {transform_indices = @transform_5, window_bounds = array<i64: 8, 128>}]} {
    %c0 = arith.constant 0 : index
    %c0_0 = arith.constant 0 : index
    %c0_1 = arith.constant 0 : index
    %0 = vector.load %arg1[%c0, %c0_0, %c0_1] : memref<2x20x16xf32, #tpu.memory_space<vmem>>, vector<2x20x16xf32>
    %1 = vector.extract_strided_slice %0 {offsets = [0, 0, 0], sizes = [2, 16, 16], strides = [1, 1, 1]} : vector<2x20x16xf32> to vector<2x16x16xf32>
    %2 = vector.shape_cast %1 : vector<2x16x16xf32> to vector<32x16xf32>
    %3 = vector.extract_strided_slice %0 {offsets = [0, 1, 0], sizes = [2, 16, 16], strides = [1, 1, 1]} : vector<2x20x16xf32> to vector<2x16x16xf32>
    %4 = vector.shape_cast %3 : vector<2x16x16xf32> to vector<32x16xf32>
    %5 = vector.extract_strided_slice %0 {offsets = [0, 2, 0], sizes = [2, 16, 16], strides = [1, 1, 1]} : vector<2x20x16xf32> to vector<2x16x16xf32>
    %6 = vector.shape_cast %5 : vector<2x16x16xf32> to vector<32x16xf32>
    %7 = vector.extract_strided_slice %0 {offsets = [0, 3, 0], sizes = [2, 16, 16], strides = [1, 1, 1]} : vector<2x20x16xf32> to vector<2x16x16xf32>
    %8 = vector.shape_cast %7 : vector<2x16x16xf32> to vector<32x16xf32>
    %9 = vector.extract_strided_slice %0 {offsets = [0, 4, 0], sizes = [2, 16, 16], strides = [1, 1, 1]} : vector<2x20x16xf32> to vector<2x16x16xf32>
    %10 = vector.shape_cast %9 : vector<2x16x16xf32> to vector<32x16xf32>
    %11 = tpu.concatenate %2, %4, %6, %8, %10 in 1 : vector<32x16xf32>, vector<32x16xf32>, vector<32x16xf32>, vector<32x16xf32>, vector<32x16xf32> -> vector<32x80xf32>
    %12 = arith.truncf %11 : vector<32x80xf32> to vector<32x80xbf16>
    %c0_2 = arith.constant 0 : index
    %c0_3 = arith.constant 0 : index
    %13 = vector.load %arg2[%c0_2, %c0_3] : memref<80x256xbf16, #tpu.memory_space<vmem>>, vector<80x256xbf16>
    %cst = arith.constant dense<0.000000e+00> : vector<32x256xf32>
    %14 = tpu.matmul %12, %13, %cst {dimension_numbers = #tpu.dot_dimension_numbers<[1], [0], [0], [1], [0, 0, 1, 1], [], []>} : vector<32x80xbf16>, vector<80x256xbf16>, vector<32x256xf32> -> vector<32x256xf32>
    %c0_4 = arith.constant 0 : index
    %c0_5 = arith.constant 0 : index
    %15 = vector.load %arg3[%c0_4, %c0_5] : memref<1x256xf32, #tpu.memory_space<vmem>>, vector<1x256xf32>
    %16 = vector.broadcast %15 : vector<1x256xf32> to vector<32x256xf32>
    %17 = arith.addf %14, %16 : vector<32x256xf32>
    %cst_6 = arith.constant 0.000000e+00 : f32
    %18 = vector.broadcast %cst_6 : f32 to vector<32x256xf32>
    %19 = arith.maximumf %17, %18 : vector<32x256xf32>
    %20 = vector.extract_strided_slice %19 {offsets = [0, 0], sizes = [32, 128], strides = [1, 1]} : vector<32x256xf32> to vector<32x128xf32>
    %21 = vector.extract_strided_slice %19 {offsets = [0, 128], sizes = [32, 128], strides = [1, 1]} : vector<32x256xf32> to vector<32x128xf32>
    %22 = arith.maximumf %20, %21 : vector<32x128xf32>
    %c0_7 = arith.constant 0 : index
    %c0_8 = arith.constant 0 : index
    %23 = vector.load %arg7[%c0_7, %c0_8] : memref<32x128xf32, #tpu.memory_space<vmem>>, vector<32x128xf32>
    tpu.vector_store %arg7[%c0_7, %c0_8], %22 {strides = array<i32>} : memref<32x128xf32, #tpu.memory_space<vmem>>, vector<32x128xf32>,
    %c0_9 = arith.constant 0 : index
    %c0_10 = arith.constant 0 : index
    %24 = tpu.strided_load %arg7[%c0_9, %c0_10] {strides = array<i32: 2, 1>} : memref<32x128xf32, #tpu.memory_space<vmem>>, vector<16x128xf32>
    %c1 = arith.constant 1 : index
    %c0_11 = arith.constant 0 : index
    %25 = tpu.strided_load %arg7[%c1, %c0_11] {strides = array<i32: 2, 1>} : memref<32x128xf32, #tpu.memory_space<vmem>>, vector<16x128xf32>
    %26 = arith.maximumf %24, %25 : vector<16x128xf32>
    %cst_12 = arith.constant 0.000000e+00 : f32
    %27 = vector.broadcast %cst_12 : f32 to vector<2x2x128xf32>
    %28 = vector.shape_cast %26 : vector<16x128xf32> to vector<2x8x128xf32>
    %29 = tpu.concatenate %27, %28, %27 in 1 : vector<2x2x128xf32>, vector<2x8x128xf32>, vector<2x2x128xf32> -> vector<2x12x128xf32>
    %30 = vector.extract_strided_slice %29 {offsets = [0, 0, 0], sizes = [2, 8, 128], strides = [1, 1, 1]} : vector<2x12x128xf32> to vector<2x8x128xf32>
    %31 = vector.shape_cast %30 : vector<2x8x128xf32> to vector<16x128xf32>
    %32 = vector.extract_strided_slice %29 {offsets = [0, 1, 0], sizes = [2, 8, 128], strides = [1, 1, 1]} : vector<2x12x128xf32> to vector<2x8x128xf32>
    %33 = vector.shape_cast %32 : vector<2x8x128xf32> to vector<16x128xf32>
    %34 = vector.extract_strided_slice %29 {offsets = [0, 2, 0], sizes = [2, 8, 128], strides = [1, 1, 1]} : vector<2x12x128xf32> to vector<2x8x128xf32>
    %35 = vector.shape_cast %34 : vector<2x8x128xf32> to vector<16x128xf32>
    %36 = vector.extract_strided_slice %29 {offsets = [0, 3, 0], sizes = [2, 8, 128], strides = [1, 1, 1]} : vector<2x12x128xf32> to vector<2x8x128xf32>
    %37 = vector.shape_cast %36 : vector<2x8x128xf32> to vector<16x128xf32>
    %38 = vector.extract_strided_slice %29 {offsets = [0, 4, 0], sizes = [2, 8, 128], strides = [1, 1, 1]} : vector<2x12x128xf32> to vector<2x8x128xf32>
    %39 = vector.shape_cast %38 : vector<2x8x128xf32> to vector<16x128xf32>
    %40 = tpu.concatenate %31, %33, %35, %37, %39 in 1 : vector<16x128xf32>, vector<16x128xf32>, vector<16x128xf32>, vector<16x128xf32>, vector<16x128xf32> -> vector<16x640xf32>
    %41 = arith.truncf %40 : vector<16x640xf32> to vector<16x640xbf16>
    %c0_13 = arith.constant 0 : index
    %c0_14 = arith.constant 0 : index
    %42 = vector.load %arg4[%c0_13, %c0_14] : memref<640x256xbf16, #tpu.memory_space<vmem>>, vector<640x256xbf16>
    %cst_15 = arith.constant dense<0.000000e+00> : vector<16x256xf32>
    %43 = tpu.matmul %41, %42, %cst_15 {dimension_numbers = #tpu.dot_dimension_numbers<[1], [0], [0], [1], [0, 0, 1, 1], [], []>} : vector<16x640xbf16>, vector<640x256xbf16>, vector<16x256xf32> -> vector<16x256xf32>
    %c0_16 = arith.constant 0 : index
    %c0_17 = arith.constant 0 : index
    %44 = vector.load %arg5[%c0_16, %c0_17] : memref<1x256xf32, #tpu.memory_space<vmem>>, vector<1x256xf32>
    %45 = vector.broadcast %44 : vector<1x256xf32> to vector<16x256xf32>
    %46 = arith.addf %43, %45 : vector<16x256xf32>
    %cst_18 = arith.constant 0.000000e+00 : f32
    %47 = vector.broadcast %cst_18 : f32 to vector<16x256xf32>
    %48 = arith.maximumf %46, %47 : vector<16x256xf32>
    %49 = vector.extract_strided_slice %48 {offsets = [0, 0], sizes = [16, 128], strides = [1, 1]} : vector<16x256xf32> to vector<16x128xf32>
    %50 = vector.extract_strided_slice %48 {offsets = [0, 128], sizes = [16, 128], strides = [1, 1]} : vector<16x256xf32> to vector<16x128xf32>
    %51 = arith.maximumf %49, %50 : vector<16x128xf32>
    %c0_19 = arith.constant 0 : index
    %c0_20 = arith.constant 0 : index
    %52 = vector.load %arg8[%c0_19, %c0_20] : memref<16x128xf32, #tpu.memory_space<vmem>>, vector<16x128xf32>
    tpu.vector_store %arg8[%c0_19, %c0_20], %51 {strides = array<i32>} : memref<16x128xf32, #tpu.memory_space<vmem>>, vector<16x128xf32>,
    %c0_21 = arith.constant 0 : index
    %c0_22 = arith.constant 0 : index
    %53 = tpu.strided_load %arg8[%c0_21, %c0_22] {strides = array<i32: 2, 1>} : memref<16x128xf32, #tpu.memory_space<vmem>>, vector<8x128xf32>
    %c1_23 = arith.constant 1 : index
    %c0_24 = arith.constant 0 : index
    %54 = tpu.strided_load %arg8[%c1_23, %c0_24] {strides = array<i32: 2, 1>} : memref<16x128xf32, #tpu.memory_space<vmem>>, vector<8x128xf32>
    %55 = arith.maximumf %53, %54 : vector<8x128xf32>
    %c0_25 = arith.constant 0 : index
    %c0_26 = arith.constant 0 : index
    %56 = vector.load %arg6[%c0_25, %c0_26] : memref<8x128xf32, #tpu.memory_space<vmem>>, vector<8x128xf32>
    tpu.vector_store %arg6[%c0_25, %c0_26], %55 {strides = array<i32>} : memref<8x128xf32, #tpu.memory_space<vmem>>, vector<8x128xf32>,
    return
  }
  func.func @transform_0(%arg0: i32) -> (i32, i32, i32) {
    %c0_i32 = arith.constant 0 : i32
    %c0_i32_0 = arith.constant 0 : i32
    %c0_i32_1 = arith.constant 0 : i32
    return %arg0, %c0_i32, %c0_i32_0 : i32, i32, i32
  }
  func.func @transform_1(%arg0: i32) -> (i32, i32) {
    %c0_i32 = arith.constant 0 : i32
    %c0_i32_0 = arith.constant 0 : i32
    %c0_i32_1 = arith.constant 0 : i32
    return %c0_i32, %c0_i32_0 : i32, i32
  }
  func.func @transform_2(%arg0: i32) -> (i32, i32) {
    %c0_i32 = arith.constant 0 : i32
    %c0_i32_0 = arith.constant 0 : i32
    %c0_i32_1 = arith.constant 0 : i32
    return %c0_i32, %c0_i32_0 : i32, i32
  }
  func.func @transform_3(%arg0: i32) -> (i32, i32) {
    %c0_i32 = arith.constant 0 : i32
    %c0_i32_0 = arith.constant 0 : i32
    %c0_i32_1 = arith.constant 0 : i32
    return %c0_i32, %c0_i32_0 : i32, i32
  }
  func.func @transform_4(%arg0: i32) -> (i32, i32) {
    %c0_i32 = arith.constant 0 : i32
    %c0_i32_0 = arith.constant 0 : i32
    %c0_i32_1 = arith.constant 0 : i32
    return %c0_i32, %c0_i32_0 : i32, i32
  }
  func.func @transform_5(%arg0: i32) -> (i32, i32) {
    %c0_i32 = arith.constant 0 : i32
    %c0_i32_0 = arith.constant 0 : i32
    return %arg0, %c0_i32 : i32, i32
  }
}

</mosaic_0001>

<bundles_post_ra>
// kernel: tile.13
= control target key start
LH: loop header
LB: loop body
LE: loop exit
PB: predicated region body
PF: predicated region fallthrough
CT: control target
= control target key end

     0   :  { %s28_s0 = inlined_call_operand.vmem [shape: f32[16], index: 0, kind: input, shape index: {}]   ;;  %s29_s1 = inlined_call_operand.vmem [shape: f32[16,16], index: 1, kind: output, shape index: {}]  }
   0x1   :  { %v4_v0 = vld [vmem:[%s28_s0] ss:$0 sm:$0xff] }
   0x2   :  { %5 = vst [vmem:[%s29_s1] sm:$0xff] %v4_v0 }
   0x3   :  { %8 = vst [vmem:[%s29_s1 + $0x8] sm:$0xff] %v4_v0 }

// kernel: tile.14
= control target key start
LH: loop header
LB: loop body
LE: loop exit
PB: predicated region body
PF: predicated region fallthrough
CT: control target
= control target key end

     0   :  { %s7_s6 = smov 3  ;;  %s21_s9 = smov 3  ;;  %vm4_vm0 = vcmask 130048   ;;  %vm11_vm1 = vcmask 1048448   ;;  %vm18_vm2 = vcmask 917248   ;;  %vm25_vm3 = vcmask 786048   ;;  %s129_s0 = inlined_call_operand.vmem [shape: f32[16,16], index: 0, kind: input, shape index: {}]   ;;  %s130_s1 = inlined_call_operand.vmem [shape: f32[1,256], index: 1, kind: output, shape index: {}]  }
   0x1   :  { %v67_v0 = vld [vmem:[%s129_s0 + $0x7] ss:$8 sm:%s7_s6]   ;;  %s82_s10 = smov 112   ;;  %v69_v1 = vld [vmem:[%s129_s0 + $0x5] ss:$8 sm:%s21_s9]   ;;  %s83_s13 = smov 80  }
   0x2   :  { %9 = vrot.lane.b32.xlu0 %v67_v0, %s82_s10  ;;  %23 = vrot.lane.b32.xlu1 %v69_v1, %s83_s13  ;;  %s14_s14 = smov 3  ;;  %s28_s15 = smov 3  ;;  %vm32_vm4 = vcmask 654848   ;;  %vm39_vm5 = vcmask 523648   ;;  %vm46_vm6 = vcmask 392448   ;;  %vm53_vm7 = vcmask 261248  }
   0x3   :  { %s35_s16 = smov 3  ;;  %v68_v3 = vld [vmem:[%s129_s0 + $0x6] ss:$8 sm:%s14_s14]   ;;  %s84_s21 = smov 48   ;;  %v70_v4 = vld [vmem:[%s129_s0 + $0x4] ss:$8 sm:%s28_s15]  }
   0x4   :  { %v71_v2 = vld [vmem:[%s129_s0 + $0x3] ss:$8 sm:%s35_s16]   ;;  %s42_s24 = smov 3  ;;  %s85_s25 = smov 96  }
   0x5   :  { %37 = vrot.lane.b32.xlu2 %v71_v2, %s84_s21  ;;  %s86_s26 = smov 64   ;;  %s49_s27 = smov 3  ;;  %v72_v5 = vld [vmem:[%s129_s0 + $0x2] ss:$8 sm:%s42_s24]  }
   0x6   :  { %v73_v6 = vld [vmem:[%s129_s0 + $0x1] ss:$8 sm:%s49_s27]   ;;  %s87_s3 = smov 32   ;;  %s88_s4 = smov 16  }
   0x7   :  { %s2_s5 = smov 3 }
   0x8   :  { %v3_v7 = vld [vmem:[%s129_s0] ss:$8 sm:%s2_s5]  }
   0x9   :  { %5 = vst.msk [vmem:[#allocation0] ss:$8 sm:$0x3] %vm4_vm0, %v3_v7  }
   0xa   :  { %16 = vrot.lane.b32.xlu0 %v68_v3, %s85_s25  ;;  %30 = vrot.lane.b32.xlu1 %v70_v4, %s86_s26 }
   0xd   :  { %44 = vrot.lane.b32.xlu2 %v72_v5, %s87_s3 }
  0x12   :  { %51 = vrot.lane.b32.xlu0 %v73_v6, %s88_s4 }
  0x5f   :  { %v38_v8 = vpop.permute.xlu2 %37  }
  0x67   :  { %v45_v9 = vpop.permute.xlu2 %44  }
  0x74   :  { %v10_v10 = vpop.permute.xlu0 %9   ;;  %v24_v11 = vpop.permute.xlu1 %23  }
  0x75   :  { %12 = vst.msk [vmem:[#allocation0] ss:$8 sm:$0x3] %vm11_vm1, %v10_v10  }
  0x7c   :  { %v17_v12 = vpop.permute.xlu0 %16   ;;  %v31_v13 = vpop.permute.xlu1 %30  }
  0x7d   :  { %19 = vst.msk [vmem:[#allocation0] ss:$8 sm:$0x3] %vm18_vm2, %v17_v12  }
  0x7e   :  { %26 = vst.msk [vmem:[#allocation0] ss:$8 sm:$0x3] %vm25_vm3, %v24_v11  }
  0x7f   :  { %33 = vst.msk [vmem:[#allocation0] ss:$8 sm:$0x3] %vm32_vm4, %v31_v13  }
  0x80   :  { %40 = vst.msk [vmem:[#allocation0] ss:$8 sm:$0x3] %vm39_vm5, %v38_v8  }
  0x81   :  { %47 = vst.msk [vmem:[#allocation0] ss:$8 sm:$0x3] %vm46_vm6, %v45_v9  }
  0x84   :  { %v52_v14 = vpop.permute.xlu0 %51  }
  0x85   :  { %54 = vst.msk [vmem:[#allocation0] ss:$8 sm:$0x3] %vm53_vm7, %v52_v14  }
  0x8c   :  { %v57_v15 = vld [vmem:[#allocation0] sm:$0x1]  ;;  %v62_v16 = vld [vmem:[#allocation0 + $0x8] sm:$0x1] }
  0x8d   :  { %60 = vst [vmem:[%s130_s1] sm:$0x1] %v57_v15 }
  0x8e   :  { %74 = vst [vmem:[%s130_s1 + $0x1] sm:$0x1] %v62_v16 }

// kernel: tile.18
= control target key start
LH: loop header
LB: loop body
LE: loop exit
PB: predicated region body
PF: predicated region fallthrough
CT: control target
= control target key end

     0   :  { %s22_s0 = inlined_call_operand.vmem [shape: f32[32], index: 0, kind: input, shape index: {}]   ;;  %s23_s1 = inlined_call_operand.vmem [shape: f32[8,32], index: 1, kind: output, shape index: {}]  }
   0x1   :  { %v4_v0 = vld [vmem:[%s22_s0] ss:$0 sm:$0xff] }
   0x2   :  { %5 = vst [vmem:[%s23_s1] sm:$0xff] %v4_v0 }

// kernel: tile.19
= control target key start
LH: loop header
LB: loop body
LE: loop exit
PB: predicated region body
PF: predicated region fallthrough
CT: control target
= control target key end

     0   :  { %s7_s6 = smov 3  ;;  %s46_s9 = smov 96   ;;  %vm4_vm0 = vcmask 261120   ;;  %vm11_vm1 = vcmask 1048320   ;;  %vm18_vm2 = vcmask 785920   ;;  %vm25_vm3 = vcmask 523520   ;;  %s77_s0 = inlined_call_operand.vmem [shape: f32[8,32], index: 0, kind: input, shape index: {}]   ;;  %s78_s1 = inlined_call_operand.vmem [shape: f32[1,256], index: 1, kind: output, shape index: {}]  }
   0x1   :  { %v39_v0 = vld [vmem:[%s77_s0 + $0x3] ss:$4 sm:%s7_s6]   ;;  %s21_s10 = smov 3  ;;  %s14_s13 = smov 3 }
   0x2   :  { %9 = vrot.lane.b32.xlu0 %v39_v0, %s46_s9  ;;  %v41_v1 = vld [vmem:[%s77_s0 + $0x1] ss:$4 sm:%s21_s10]   ;;  %s47_s14 = smov 32   ;;  %s48_s17 = smov 64  }
   0x3   :  { %23 = vrot.lane.b32.xlu1 %v41_v1, %s47_s14  ;;  %v40_v2 = vld [vmem:[%s77_s0 + $0x2] ss:$4 sm:%s14_s13]   ;;  %s2_s18 = smov 3 }
   0x4   :  { %v3_v3 = vld [vmem:[%s77_s0] ss:$4 sm:%s2_s18]  }
   0x5   :  { %5 = vst.msk [vmem:[#allocation0] ss:$8 sm:$0x3] %vm4_vm0, %v3_v3  }
   0xa   :  { %16 = vrot.lane.b32.xlu0 %v40_v2, %s48_s17 }
  0x74   :  { %v10_v4 = vpop.permute.xlu0 %9  }
  0x75   :  { %12 = vst.msk [vmem:[#allocation0] ss:$8 sm:$0x3] %vm11_vm1, %v10_v4   ;;  %v24_v5 = vpop.permute.xlu1 %23  }
  0x7c   :  { %v17_v6 = vpop.permute.xlu0 %16  }
  0x7d   :  { %19 = vst.msk [vmem:[#allocation0] ss:$8 sm:$0x3] %vm18_vm2, %v17_v6  }
  0x7e   :  { %26 = vst.msk [vmem:[#allocation0] ss:$8 sm:$0x3] %vm25_vm3, %v24_v5  }
  0x85   :  { %v29_v7 = vld [vmem:[#allocation0] sm:$0x1]  ;;  %v34_v8 = vld [vmem:[#allocation0 + $0x8] sm:$0x1] }
  0x86   :  { %32 = vst [vmem:[%s78_s1] sm:$0x1] %v29_v7 }
  0x87   :  { %42 = vst [vmem:[%s78_s1 + $0x1] sm:$0x1] %v34_v8 }

// kernel: cnn_prenet_forward.1
= control target key start
LH: loop header
LB: loop body
LE: loop exit
PB: predicated region body
PF: predicated region fallthrough
CT: control target
= control target key end

     0   :  { %vm33_vm0 = vcmask 1046528   ;;  %vm55_vm1 = vcmask 1044480   ;;  %vm44_vm2 = vcmask 1045504   ;;  %vm66_vm3 = vcmask 1043456   ;;  %s1486_s26 = smov 16   ;;  %s1487_s6 = smov 48   ;;  %s2217_s0 = inlined_call_operand.vmem [shape: f32[2,20,16], index: 0, kind: input, shape index: {}]   ;;  %s2218_s1 = inlined_call_operand.vmem [shape: bf16[80,256], index: 1, kind: input, shape index: {}]   ;;  %s2219_s3 = inlined_call_operand.vmem [shape: bf16[640,256], index: 3, kind: input, shape index: {}]   ;;  %s2220_s2 = inlined_call_operand.vmem [shape: f32[1,256], index: 2, kind: input, shape index: {}]   ;;  %s2221_s4 = inlined_call_operand.vmem [shape: f32[1,256], index: 4, kind: input, shape index: {}]   ;;  %s2222_s5 = inlined_call_operand.vmem [shape: f32[8,128], index: 5, kind: output, shape index: {}]  }
   0x1   :  { %v1523_v0 = vld [vmem:[%s2217_s0] sm:$0xff]  ;;  %v1528_v1 = vld [vmem:[%s2217_s0 + $0x8] sm:$0xff]  ;;  %v23_v2 = vld [vmem:[%s2217_s0 + $0x10] sm:$0xf]  ;;  %s1488_s14 = smov 32   ;;  %s1489_s15 = smov 64  }
   0x2   :  { %v34_v3 = vrot.slane %v1523_v0, 1  ;;  %v35_v4 = vrot.slane %v1528_v1, 1  ;;  %v37_v5 = vrot.slane %v23_v2, 1  ;;  %v56_v6 = vrot.slane %v1523_v0, 3  ;;  %v1550_v23 = vld [vmem:[%s2217_s0 + $0x18] sm:$0xff]  ;;  %v1556_v24 = vld [vmem:[%s2217_s0 + $0x20] sm:$0xff] }
   0x3   :  { %v57_v7 = vrot.slane %v1528_v1, 3  ;;  %v59_v8 = vrot.slane %v23_v2, 3  ;;  %v45_v9 = vrot.slane %v1523_v0, 2  ;;  %v46_v10 = vrot.slane %v1528_v1, 2  ;;  %v26_v25 = vld [vmem:[%s2217_s0 + $0x28] sm:$0xf] }
   0x4   :  { %v36_v11 = vsel %vm33_vm0, %v34_v3, %v35_v4  ;;  %v38_v12 = vsel %vm33_vm0, %v35_v4, %v37_v5  ;;  %v48_v13 = vrot.slane %v23_v2, 2  ;;  %v67_v14 = vrot.slane %v1523_v0, 4  ;;  %v1012_v28 = vld [vmem:[%s2218_s1 + $0x40] sm:$0xf]  ;;  %v1361_v31 = vld [vmem:[%s2218_s1 + $0x44] sm:$0xf0] }
   0x5   :  { %v1446_v15 = vpack.i.bf16 %v38_v12, %v36_v11  ;;  %v58_v16 = vsel %vm55_vm1, %v56_v6, %v57_v7  ;;  %v60_v17 = vsel %vm55_vm1, %v57_v7, %v59_v8  ;;  %v47_v18 = vsel %vm44_vm2, %v45_v9, %v46_v10  ;;  %v1360_v32 = vld [vmem:[%s2218_s1 + $0x44] sm:$0xf]  ;;  %v1014_v37 = vld [vmem:[%s2218_s1 + $0x48] sm:$0xf0]  ;;  %v1004_v60 = vld [vmem:[%s2218_s1 + $0x30] sm:$0xf] }
   0x6   :  { %v1456_v19 = vpack.i.bf16 %v60_v17, %v58_v16  ;;  %v49_v20 = vsel %vm44_vm2, %v46_v10, %v48_v13  ;;  %v68_v21 = vrot.slane %v1528_v1, 4  ;;  %v70_v22 = vrot.slane %v23_v2, 4  ;;  %v1359_v61 = vld [vmem:[%s2218_s1 + $0x34] sm:$0xf0]  ;;  %v1358_v62 = vld [vmem:[%s2218_s1 + $0x34] sm:$0xf] }
   0x7   :  { %1447 = vrot.lane.b32.xlu0 %v1446_v15, %s1486_s26  ;;  %v1451_v29 = vpack.i.bf16 %v49_v20, %v47_v18  ;;  %v61_v30 = vrot.slane %v1550_v23, 3  ;;  %v62_v33 = vrot.slane %v1556_v24, 3  ;;  %v64_v34 = vrot.slane %v26_v25, 3  ;;  %v1006_v2 = vld [vmem:[%s2218_s1 + $0x38] sm:$0xf0] }
   0x8   :  { %1457 = vrot.lane.b32.xlu1 %v1456_v19, %s1487_s6  ;;  %v69_v26 = vsel %vm66_vm3, %v67_v14, %v68_v21  ;;  %v71_v27 = vsel %vm66_vm3, %v68_v21, %v70_v22  ;;  %v39_v35 = vrot.slane %v1550_v23, 1  ;;  %v40_v36 = vrot.slane %v1556_v24, 1  ;;  %v996_v4 = vld [vmem:[%s2218_s1 + $0x20] sm:$0xf]  ;;  %v1357_v5 = vld [vmem:[%s2218_s1 + $0x24] sm:$0xf0] }
   0x9   :  { %v1461_v38 = vpack.i.bf16 %v71_v27, %v69_v26  ;;  %v72_v39 = vrot.slane %v1550_v23, 4  ;;  %v73_v40 = vrot.slane %v1556_v24, 4  ;;  %v42_v41 = vrot.slane %v26_v25, 1  ;;  %v1356_v6 = vld [vmem:[%s2218_s1 + $0x24] sm:$0xf] }
   0xa   :  { %v75_v42 = vrot.slane %v26_v25, 4  ;;  %v41_v43 = vsel %vm33_vm0, %v39_v35, %v40_v36  ;;  %v50_v44 = vrot.slane %v1550_v23, 2  ;;  %v1013_v45 = vor.u32 %v1361_v31, %v1012_v28  ;;  %v998_v8 = vld [vmem:[%s2218_s1 + $0x28] sm:$0xf0]  ;;  %v988_v10 = vld [vmem:[%s2218_s1 + $0x10] sm:$0xf] }
   0xb   :  { %v43_v46 = vsel %vm33_vm0, %v40_v36, %v42_v41  ;;  %v51_v47 = vrot.slane %v1556_v24, 2  ;;  %v53_v48 = vrot.slane %v26_v25, 2  ;;  %v1017_v49 = vor.u32 %v1360_v32, %v1014_v37  ;;  %v1355_v11 = vld [vmem:[%s2218_s1 + $0x14] sm:$0xf0]  ;;  %v1354_v12 = vld [vmem:[%s2218_s1 + $0x14] sm:$0xf] }
   0xc   :  { %v1466_v50 = vpack.i.bf16 %v43_v46, %v41_v43  ;;  %223 = vmatpush.bf16.msra.mxu0 %v1013_v45  ;;  %v63_v51 = vsel %vm55_vm1, %v61_v30, %v62_v33  ;;  %v65_v52 = vsel %vm55_vm1, %v62_v33, %v64_v34  ;;  %v74_v53 = vsel %vm66_vm3, %v72_v39, %v73_v40  ;;  %v990_v14 = vld [vmem:[%s2218_s1 + $0x18] sm:$0xf0]  ;;  %v980_v16 = vld [vmem:[%s2218_s1] sm:$0xf]  ;;  %v1353_v17 = vld [vmem:[%s2218_s1 + $0x4] sm:$0xf0] }
   0xd   :  { %242 = vmatpush.bf16.msra.mxu1 %v1017_v49  ;;  %v76_v54 = vsel %vm66_vm3, %v73_v40, %v75_v42  ;;  %v52_v55 = vsel %vm44_vm2, %v50_v44, %v51_v47  ;;  %v54_v56 = vsel %vm44_vm2, %v51_v47, %v53_v48  ;;  %v1476_v57 = vpack.i.bf16 %v65_v52, %v63_v51  ;;  %v1352_v18 = vld [vmem:[%s2218_s1 + $0x4] sm:$0xf]  ;;  %v982_v20 = vld [vmem:[%s2218_s1 + $0x8] sm:$0xf0]  ;;  %v1080_v25 = vld [vmem:[%s2219_s3 + $0x70] sm:$0xf] }
   0xe   :  { %1467 = vrot.lane.b32.xlu2 %v1466_v50, %s1486_s26  ;;  %v1481_v58 = vpack.i.bf16 %v76_v54, %v74_v53  ;;  %v1471_v59 = vpack.i.bf16 %v54_v56, %v52_v55  ;;  %v1005_v63 = vor.u32 %v1359_v61, %v1004_v60  ;;  %v1009_v3 = vor.u32 %v1358_v62, %v1006_v2  ;;  %v1377_v26 = vld [vmem:[%s2219_s3 + $0x74] sm:$0xf0]  ;;  %v1072_v27 = vld [vmem:[%s2219_s3 + $0x60] sm:$0xf]  ;;  %v1375_v30 = vld [vmem:[%s2219_s3 + $0x64] sm:$0xf0] }
   0xf   :  { %1452 = vrot.lane.b32.xlu0 %v1451_v29, %s1488_s14  ;;  %v997_v7 = vor.u32 %v1357_v5, %v996_v4  ;;  %v1001_v9 = vor.u32 %v1356_v6, %v998_v8  ;;  %v989_v13 = vor.u32 %v1355_v11, %v988_v10  ;;  %v993_v15 = vor.u32 %v1354_v12, %v990_v14  ;;  %v1144_v31 = vld [vmem:[%s2219_s3 + $0xf0] sm:$0xf]  ;;  %v1393_v32 = vld [vmem:[%s2219_s3 + $0xf4] sm:$0xf0]  ;;  %v1136_v34 = vld [vmem:[%s2219_s3 + $0xe0] sm:$0xf] }
  0x10   :  { %1462 = vrot.lane.b32.xlu1 %v1461_v38, %s1489_s15  ;;  %224 = vmatpush.bf16.msra.mxu0 %v1005_v63  ;;  %v981_v19 = vor.u32 %v1353_v17, %v980_v16  ;;  %v985_v21 = vor.u32 %v1352_v18, %v982_v20  ;;  %v1081_v29 = vor.u32 %v1377_v26, %v1080_v25  ;;  %v1391_v36 = vld [vmem:[%s2219_s3 + $0xe4] sm:$0xf0]  ;;  %v1064_v38 = vld [vmem:[%s2219_s3 + $0x50] sm:$0xf]  ;;  %v1373_v39 = vld [vmem:[%s2219_s3 + $0x54] sm:$0xf0] }
  0x11   :  { %243 = vmatpush.bf16.msra.mxu1 %v1009_v3  ;;  %v1145_v33 = vor.u32 %v1393_v32, %v1144_v31  ;;  %v1073_v35 = vor.u32 %v1375_v30, %v1072_v27  ;;  %v1137_v40 = vor.u32 %v1391_v36, %v1136_v34  ;;  %vm125_vm4 = vcmask 130048   ;;  %v1371_v16 = vld [vmem:[%s2219_s3 + $0x44] sm:$0xf0]  ;;  %v1128_v17 = vld [vmem:[%s2219_s3 + $0xd0] sm:$0xf] }
  0x12   :  { %821 = vmatpush.bf16.msra.mxu2 %v1081_v29  ;;  %v1065_v43 = vor.u32 %v1373_v39, %v1064_v38  ;;  %vm130_vm5 = vcmask 261120   ;;  %vm135_vm6 = vcmask 392192   ;;  %vm140_vm7 = vcmask 523264   ;;  %v1120_v25 = vld [vmem:[%s2219_s3 + $0xc0] sm:$0xf] }
  0x13   :  { %835 = vmatpush.bf16.msra.mxu3 %v1145_v33  ;;  %vm213_vm8 = vcmask 654336   ;;  %v1387_v27 = vld [vmem:[%s2219_s3 + $0xc4] sm:$0xf0]  ;;  %v1409_v29 = vld [vmem:[%s2219_s3 + $0x174] sm:$0xf0]  ;;  %vm289_vm9 = vcmask 1041408  }
  0x14   :  { %225 = vmatpush.bf16.msra.mxu0 %v997_v7  ;;  %v1121_v30 = vor.u32 %v1387_v27, %v1120_v25  ;;  %v1272_v32 = vld [vmem:[%s2219_s3 + $0x1f0] sm:$0xf]  ;;  %v1425_v33 = vld [vmem:[%s2219_s3 + $0x1f4] sm:$0xf0]  ;;  %v1367_v36 = vld [vmem:[%s2219_s3 + $0x24] sm:$0xf0] }
  0x15   :  { %244 = vmatpush.bf16.msra.mxu1 %v1001_v9  ;;  %v1273_v34 = vor.u32 %v1425_v33, %v1272_v32  ;;  %v1385_v39 = vld [vmem:[%s2219_s3 + $0xb4] sm:$0xf0]  ;;  %v1168_v25 = vld [vmem:[%s2219_s3 + $0x120] sm:$0xf]  ;;  %vm2075_vm10 = vmneg %vm289_vm9 }
  0x16   :  { %1472 = vrot.lane.b32.xlu2 %v1471_v59, %s1488_s14  ;;  %822 = vmatpush.bf16.msra.mxu2 %v1073_v35  ;;  %v1040_v35 = vld [vmem:[%s2219_s3 + $0x20] sm:$0xf]  ;;  %vm1344_vm11 = vmpackc.low %vm2075_vm10, %vm2075_vm10 }
  0x17   :  { %1477 = vrot.lane.b32.xlu0 %v1476_v57, %s1487_s6  ;;  %836 = vmatpush.bf16.msra.mxu3 %v1137_v40  ;;  %v1041_v38 = vor.u32 %v1367_v36, %v1040_v35  ;;  %v1200_v40 = vld [vmem:[%s2219_s3 + $0x160] sm:$0xf]  ;;  %v1074_v35 = vld [vmem:[%s2219_s3 + $0x68] sm:$0xf0] }
  0x18   :  { %1482 = vrot.lane.b32.xlu1 %v1481_v58, %s1489_s15  ;;  %226 = vmatpush.bf16.msra.mxu0 %v989_v13  ;;  %v1232_v27 = vld [vmem:[%s2219_s3 + $0x1a0] sm:$0xf] }
  0x19   :  { %245 = vmatpush.bf16.msra.mxu1 %v993_v15  ;;  %v157_v36 = vld [vmem:[%s2220_s2] sm:$0x3] }
  0x1a   :  { %823 = vmatpush.bf16.msra.mxu2 %v1065_v43 }
  0x1c   :  { %227 = vmatpush.bf16.msra.mxu0 %v981_v19  ;;  %v1389_v19 = vld [vmem:[%s2219_s3 + $0xd4] sm:$0xf0] }
  0x1d   :  { %246 = vmatpush.bf16.msra.mxu1 %v985_v21  ;;  %v1129_v20 = vor.u32 %v1389_v19, %v1128_v17  ;;  %v1048_v21 = vld [vmem:[%s2219_s3 + $0x30] sm:$0xf]  ;;  %v1439_v17 = vld [vmem:[%s2219_s3 + $0x264] sm:$0xf0] }
  0x1f   :  { %837 = vmatpush.bf16.msra.mxu3 %v1129_v20  ;;  %v1376_v20 = vld [vmem:[%s2219_s3 + $0x74] sm:$0xf] }
  0x21   :  { %863 = vmatpush.bf16.msrb.mxu1 %v1273_v34  ;;  %v1374_v34 = vld [vmem:[%s2219_s3 + $0x64] sm:$0xf] }
  0x23   :  { %838 = vmatpush.bf16.msra.mxu3 %v1121_v30  ;;  %v1320_v30 = vld [vmem:[%s2219_s3 + $0x250] sm:$0xf] }
  0x68   :  { %v1468_v37 = vpop.permute.xlu2 %1467 }
  0x69   :  { %v1469_v60 = vunpack.i.l.bf16 %v1468_v37 }
  0x6b   :  { %v128_v4 = vsel %vm125_vm4, %v1550_v23, %v1469_v60  ;;  %v1056_v23 = vld [vmem:[%s2219_s3 + $0x40] sm:$0xf]  ;;  %v1096_v60 = vld [vmem:[%s2219_s3 + $0x90] sm:$0xf] }
  0x6c   :  { %v1057_v18 = vor.u32 %v1371_v16, %v1056_v23  ;;  %v1417_v23 = vld [vmem:[%s2219_s3 + $0x1b4] sm:$0xf0]  ;;  %v1328_v16 = vld [vmem:[%s2219_s3 + $0x260] sm:$0xf] }
  0x6d   :  { %v1329_v19 = vor.u32 %v1439_v17, %v1328_v16  ;;  %v1138_v17 = vld [vmem:[%s2219_s3 + $0xe8] sm:$0xf0] }
  0x6e   :  { %824 = vmatpush.bf16.msra.mxu2 %v1057_v18 }
  0x79   :  { %v1448_v22 = vpop.permute.xlu0 %1447 }
  0x7a   :  { %v1458_v28 = vpop.permute.xlu1 %1457  ;;  %v1450_v41 = vunpack.i.h.bf16 %v1448_v22  ;;  %v1449_v42 = vunpack.i.l.bf16 %v1448_v22  ;;  %v1369_v22 = vld [vmem:[%s2219_s3 + $0x34] sm:$0xf0] }
  0x7b   :  { %v1460_v45 = vunpack.i.h.bf16 %v1458_v28  ;;  %v1459_v46 = vunpack.i.l.bf16 %v1458_v28  ;;  %v1049_v26 = vor.u32 %v1369_v22, %v1048_v21  ;;  %v1208_v28 = vld [vmem:[%s2219_s3 + $0x170] sm:$0xf]  ;;  %v1082_v21 = vld [vmem:[%s2219_s3 + $0x78] sm:$0xf0] }
  0x7c   :  { %v127_v50 = vsel %vm125_vm4, %v1528_v1, %v1450_v41  ;;  %v126_v51 = vsel %vm125_vm4, %v1523_v0, %v1449_v42  ;;  %v1470_v1 = vunpack.i.h.bf16 %v1468_v37  ;;  %v1473_v0 = vpop.permute.xlu2 %1472  ;;  %v1209_v31 = vor.u32 %v1409_v29, %v1208_v28  ;;  %v1112_v37 = vld [vmem:[%s2219_s3 + $0xb0] sm:$0xf]  ;;  %v1407_v41 = vld [vmem:[%s2219_s3 + $0x164] sm:$0xf0] }
  0x7d   :  { %v1475_v62 = vunpack.i.h.bf16 %v1473_v0  ;;  %v1474_v63 = vunpack.i.l.bf16 %v1473_v0  ;;  %825 = vmatpush.bf16.msra.mxu2 %v1049_v26  ;;  %v1113_v42 = vor.u32 %v1385_v39, %v1112_v37  ;;  %v1201_v43 = vor.u32 %v1407_v41, %v1200_v40  ;;  %v1381_v0 = vld [vmem:[%s2219_s3 + $0x94] sm:$0xf0]  ;;  %v1399_v26 = vld [vmem:[%s2219_s3 + $0x124] sm:$0xf0]  ;;  %v1224_v40 = vld [vmem:[%s2219_s3 + $0x190] sm:$0xf] }
  0x7e   :  { %v129_v3 = vsel %vm125_vm4, %v1556_v24, %v1470_v1  ;;  %849 = vmatpush.bf16.msrb.mxu0 %v1209_v31  ;;  %v1363_v1 = vld [vmem:[%s2219_s3 + $0x4] sm:$0xf0]  ;;  %v1085_v22 = vor.u32 %v1376_v20, %v1082_v21  ;;  %v1169_v28 = vor.u32 %v1399_v26, %v1168_v25  ;;  %v1437_v31 = vld [vmem:[%s2219_s3 + $0x254] sm:$0xf0]  ;;  %v1077_v37 = vor.u32 %v1374_v34, %v1074_v35  ;;  %v1288_v25 = vld [vmem:[%s2219_s3 + $0x210] sm:$0xf] }
  0x7f   :  { %v133_v8 = vsel %vm130_vm5, %v128_v4, %v1474_v63  ;;  %v134_v9 = vsel %vm130_vm5, %v129_v3, %v1475_v62  ;;  %839 = vmatpush.bf16.msra.mxu3 %v1113_v42  ;;  %v1184_v62 = vld [vmem:[%s2219_s3 + $0x140] sm:$0xf]  ;;  %v1403_v63 = vld [vmem:[%s2219_s3 + $0x144] sm:$0xf0]  ;;  %v1321_v33 = vor.u32 %v1437_v31, %v1320_v30  ;;  %v1397_v39 = vld [vmem:[%s2219_s3 + $0x114] sm:$0xf0] }
  0x80   :  { %v1185_v3 = vor.u32 %v1403_v63, %v1184_v62  ;;  %v1248_v4 = vld [vmem:[%s2219_s3 + $0x1c0] sm:$0xf]  ;;  %v1415_v29 = vld [vmem:[%s2219_s3 + $0x1a4] sm:$0xf0]  ;;  %v1413_v42 = vld [vmem:[%s2219_s3 + $0x194] sm:$0xf0] }
  0x81   :  { %v1453_v44 = vpop.permute.xlu0 %1452  ;;  %826 = vmatpush.bf16.msra.mxu2 %v1041_v38  ;;  %v1233_v32 = vor.u32 %v1415_v29, %v1232_v27  ;;  %v1160_v38 = vld [vmem:[%s2219_s3 + $0x110] sm:$0xf]  ;;  %v1058_v62 = vld [vmem:[%s2219_s3 + $0x48] sm:$0xf0]  ;;  %v1392_v63 = vld [vmem:[%s2219_s3 + $0xf4] sm:$0xf] }
  0x82   :  { %v1455_v47 = vunpack.i.h.bf16 %v1453_v44  ;;  %v1454_v48 = vunpack.i.l.bf16 %v1453_v44  ;;  %v1463_v49 = vpop.permute.xlu1 %1462  ;;  %v1264_v44 = vld [vmem:[%s2219_s3 + $0x1e0] sm:$0xf]  ;;  %850 = vmatpush.bf16.msrb.mxu0 %v1201_v43  ;;  %v1161_v41 = vor.u32 %v1397_v39, %v1160_v38  ;;  %v1429_v26 = vld [vmem:[%s2219_s3 + $0x214] sm:$0xf0]  ;;  %v1366_v27 = vld [vmem:[%s2219_s3 + $0x24] sm:$0xf] }
  0x83   :  { %v1465_v52 = vunpack.i.h.bf16 %v1463_v49  ;;  %v1464_v53 = vunpack.i.l.bf16 %v1463_v49  ;;  %v1104_v49 = vld [vmem:[%s2219_s3 + $0xa0] sm:$0xf]  ;;  %v1388_v29 = vld [vmem:[%s2219_s3 + $0xd4] sm:$0xf]  ;;  %v1130_v30 = vld [vmem:[%s2219_s3 + $0xd8] sm:$0xf0]  ;;  %v1289_v31 = vor.u32 %v1429_v26, %v1288_v25 }
  0x84   :  { %v131_v54 = vsel %vm130_vm5, %v126_v51, %v1454_v48  ;;  %v132_v55 = vsel %vm130_vm5, %v127_v50, %v1455_v47  ;;  %v1032_v47 = vld [vmem:[%s2219_s3 + $0x10] sm:$0xf]  ;;  %v1365_v48 = vld [vmem:[%s2219_s3 + $0x14] sm:$0xf0]  ;;  %v1383_v51 = vld [vmem:[%s2219_s3 + $0xa4] sm:$0xf0] }
  0x85   :  { %v136_v56 = vsel %vm135_vm6, %v131_v54, %v1459_v46  ;;  %v137_v57 = vsel %vm135_vm6, %v132_v55, %v1460_v45  ;;  %v1423_v45 = vld [vmem:[%s2219_s3 + $0x1e4] sm:$0xf0]  ;;  %v1033_v50 = vor.u32 %v1365_v48, %v1032_v47  ;;  %v1105_v54 = vor.u32 %v1383_v51, %v1104_v49  ;;  %v1312_v43 = vld [vmem:[%s2219_s3 + $0x240] sm:$0xf]  ;;  %v1372_v47 = vld [vmem:[%s2219_s3 + $0x54] sm:$0xf] }
  0x86   :  { %v141_v58 = vsel %vm140_vm7, %v136_v56, %v1464_v53  ;;  %v142_v59 = vsel %vm140_vm7, %v137_v57, %v1465_v52  ;;  %v1265_v46 = vor.u32 %v1423_v45, %v1264_v44  ;;  %v1192_v52 = vld [vmem:[%s2219_s3 + $0x150] sm:$0xf]  ;;  %v1405_v53 = vld [vmem:[%s2219_s3 + $0x154] sm:$0xf0]  ;;  %v1435_v44 = vld [vmem:[%s2219_s3 + $0x244] sm:$0xf0]  ;;  %v1225_v45 = vor.u32 %v1413_v42, %v1224_v40 }
  0x87   :  { %v145_v61 = vpack.c.bf16 %v142_v59, %v141_v58  ;;  %v1193_v55 = vor.u32 %v1405_v53, %v1192_v52  ;;  %v1256_v56 = vld [vmem:[%s2219_s3 + $0x1d0] sm:$0xf]  ;;  %v1421_v57 = vld [vmem:[%s2219_s3 + $0x1d4] sm:$0xf0]  ;;  %827 = vmatpush.bf16.msra.mxu2 %v1033_v50  ;;  %840 = vmatpush.bf16.msra.mxu3 %v1105_v54  ;;  %v1024_v59 = vld [vmem:[%s2219_s3] sm:$0xf] }
  0x88   :  { %864 = vmatpush.bf16.msrb.mxu1 %v1265_v46  ;;  %v1257_v58 = vor.u32 %v1421_v57, %v1256_v56  ;;  %v1313_v46 = vor.u32 %v1435_v44, %v1312_v43  ;;  %v1066_v48 = vld [vmem:[%s2219_s3 + $0x58] sm:$0xf0]  ;;  %v1891_v49 = vperm.slane %v157_v36, 0  ;;  %v1893_v50 = vperm.slane %v157_v36, 1  ;;  %v1152_v52 = vld [vmem:[%s2219_s3 + $0x100] sm:$0xf] }
  0x89   :  { %1018 = vmatmul.msk.bf16.vlgmr.msra.gmra.mxu0 %vm213_vm8, %v145_v61  ;;  %1020 = vmatmul.msk.bf16.vlgmr.msra.gmra.mxu1 %vm213_vm8, %v145_v61  ;;  %v1478_v2 = vpop.permute.xlu0 %1477  ;;  %v1025_v61 = vor.u32 %v1363_v1, %v1024_v59  ;;  %v1069_v51 = vor.u32 %v1372_v47, %v1066_v48  ;;  %v1395_v53 = vld [vmem:[%s2219_s3 + $0x104] sm:$0xf0]  ;;  %v1216_v54 = vld [vmem:[%s2219_s3 + $0x180] sm:$0xf]  ;;  %v1304_v57 = vld [vmem:[%s2219_s3 + $0x230] sm:$0xf] }
  0x8a   :  { %v1480_v5 = vunpack.i.h.bf16 %v1478_v2  ;;  %v1479_v6 = vunpack.i.l.bf16 %v1478_v2  ;;  %v1483_v7 = vpop.permute.xlu1 %1482  ;;  %851 = vmatpush.bf16.msrb.mxu0 %v1193_v55  ;;  %v1097_v2 = vor.u32 %v1381_v0, %v1096_v60  ;;  %v1153_v55 = vor.u32 %v1395_v53, %v1152_v52  ;;  %v1411_v56 = vld [vmem:[%s2219_s3 + $0x184] sm:$0xf0]  ;;  %v1370_v0 = vld [vmem:[%s2219_s3 + $0x44] sm:$0xf]  ;;  %v1194_v34 = vld [vmem:[%s2219_s3 + $0x158] sm:$0xf0] }
  0x8b   :  { %v1485_v10 = vunpack.i.h.bf16 %v1483_v7  ;;  %v1484_v11 = vunpack.i.l.bf16 %v1483_v7  ;;  %828 = vmatpush.bf16.msra.mxu2 %v1025_v61  ;;  %v1217_v60 = vor.u32 %v1411_v56, %v1216_v54  ;;  %v1427_v42 = vld [vmem:[%s2219_s3 + $0x204] sm:$0xf0]  ;;  %v1034_v47 = vld [vmem:[%s2219_s3 + $0x18] sm:$0xf0]  ;;  %v1122_v52 = vld [vmem:[%s2219_s3 + $0xc8] sm:$0xf0] }
  0x8c   :  { %v139_v12 = vsel %vm135_vm6, %v134_v9, %v1480_v5  ;;  %v138_v13 = vsel %vm135_vm6, %v133_v8, %v1479_v6  ;;  %865 = vmatpush.bf16.msrb.mxu1 %v1257_v58  ;;  %v1419_v5 = vld [vmem:[%s2219_s3 + $0x1c4] sm:$0xf0]  ;;  %v1336_v6 = vld [vmem:[%s2219_s3 + $0x270] sm:$0xf]  ;;  %v1441_v8 = vld [vmem:[%s2219_s3 + $0x274] sm:$0xf0]  ;;  %841 = vmatpush.bf16.msra.mxu3 %v1097_v2 }
  0x8d   :  { %v143_v14 = vsel %vm140_vm7, %v138_v13, %v1484_v11  ;;  %v144_v24 = vsel %vm140_vm7, %v139_v12, %v1485_v10  ;;  %v1249_v7 = vor.u32 %v1419_v5, %v1248_v4  ;;  %v1337_v9 = vor.u32 %v1441_v8, %v1336_v6  ;;  %v1088_v10 = vld [vmem:[%s2219_s3 + $0x80] sm:$0xf]  ;;  %v1379_v11 = vld [vmem:[%s2219_s3 + $0x84] sm:$0xf0]  ;;  %v1176_v13 = vld [vmem:[%s2219_s3 + $0x130] sm:$0xf] }
  0x8e   :  { %v146_v15 = vpack.c.bf16 %v144_v24, %v143_v14  ;;  %852 = vmatpush.bf16.msrb.mxu0 %v1185_v3  ;;  %v1089_v12 = vor.u32 %v1379_v11, %v1088_v10  ;;  %v1401_v14 = vld [vmem:[%s2219_s3 + $0x134] sm:$0xf0]  ;;  %v1240_v24 = vld [vmem:[%s2219_s3 + $0x1b0] sm:$0xf]  ;;  %v1061_v4 = vor.u32 %v1370_v0, %v1058_v62  ;;  %v1146_v5 = vld [vmem:[%s2219_s3 + $0xf8] sm:$0xf0] }
  0x8f   :  { %877 = vmatpush.bf16.msrb.mxu2 %v1337_v9  ;;  %v1241_v18 = vor.u32 %v1417_v23, %v1240_v24  ;;  %v1433_v58 = vld [vmem:[%s2219_s3 + $0x234] sm:$0xf0]  ;;  %v1408_v6 = vld [vmem:[%s2219_s3 + $0x174] sm:$0xf]  ;;  %v1149_v8 = vor.u32 %v1392_v63, %v1146_v5  ;;  %v1296_v10 = vld [vmem:[%s2219_s3 + $0x220] sm:$0xf] }
  0x90   :  { %866 = vmatpush.bf16.msrb.mxu1 %v1249_v7  ;;  %842 = vmatpush.bf16.msra.mxu3 %v1089_v12  ;;  %v1305_v61 = vor.u32 %v1433_v58, %v1304_v57  ;;  %v1210_v7 = vld [vmem:[%s2219_s3 + $0x178] sm:$0xf0]  ;;  %v1431_v11 = vld [vmem:[%s2219_s3 + $0x224] sm:$0xf0]  ;;  %v1368_v12 = vld [vmem:[%s2219_s3 + $0x34] sm:$0xf] }
  0x91   :  { %v1213_v9 = vor.u32 %v1408_v6, %v1210_v7  ;;  %v1297_v24 = vor.u32 %v1431_v11, %v1296_v10  ;;  %v1390_v23 = vld [vmem:[%s2219_s3 + $0xe4] sm:$0xf]  ;;  %v1186_v56 = vld [vmem:[%s2219_s3 + $0x148] sm:$0xf0]  ;;  %v1384_v0 = vld [vmem:[%s2219_s3 + $0xb4] sm:$0xf] }
  0x92   :  { %v1141_v21 = vor.u32 %v1390_v23, %v1138_v17  ;;  %v1402_v53 = vld [vmem:[%s2219_s3 + $0x144] sm:$0xf]  ;;  %v1114_v62 = vld [vmem:[%s2219_s3 + $0xb8] sm:$0xf0]  ;;  %v1400_v63 = vld [vmem:[%s2219_s3 + $0x134] sm:$0xf] }
  0x93   :  { %878 = vmatpush.bf16.msrb.mxu2 %v1329_v19  ;;  %v1202_v19 = vld [vmem:[%s2219_s3 + $0x168] sm:$0xf0]  ;;  %v1189_v57 = vor.u32 %v1402_v53, %v1186_v56  ;;  %v1362_v58 = vld [vmem:[%s2219_s3 + $0x4] sm:$0xf]  ;;  %v1178_v5 = vld [vmem:[%s2219_s3 + $0x138] sm:$0xf0] }
  0x94   :  { %867 = vmatpush.bf16.msrb.mxu1 %v1241_v18  ;;  %891 = vmatpush.bf16.msrb.mxu3 %v1085_v22  ;;  %v1406_v18 = vld [vmem:[%s2219_s3 + $0x164] sm:$0xf]  ;;  %v1181_v6 = vor.u32 %v1400_v63, %v1178_v5  ;;  %v1106_v10 = vld [vmem:[%s2219_s3 + $0xa8] sm:$0xf0]  ;;  %v1098_v23 = vld [vmem:[%s2219_s3 + $0x98] sm:$0xf0] }
  0x95   :  { %v1205_v22 = vor.u32 %v1406_v18, %v1202_v19  ;;  %v1396_v19 = vld [vmem:[%s2219_s3 + $0x114] sm:$0xf] }
  0x97   :  { %879 = vmatpush.bf16.msrb.mxu2 %v1321_v33  ;;  %v1404_v33 = vld [vmem:[%s2219_s3 + $0x154] sm:$0xf] }
  0x98   :  { %868 = vmatpush.bf16.msrb.mxu1 %v1233_v32  ;;  %892 = vmatpush.bf16.msrb.mxu3 %v1077_v37  ;;  %v1133_v37 = vor.u32 %v1388_v29, %v1130_v30  ;;  %v1197_v38 = vor.u32 %v1404_v33, %v1194_v34 }
  0x99   :  { %1019 = vmatmul.msk.bf16.gmra.mxu0 %vm213_vm8, %v146_v15  ;;  %1021 = vmatmul.msk.bf16.gmra.mxu1 %vm213_vm8, %v146_v15  ;;  %v1177_v15 = vor.u32 %v1401_v14, %v1176_v13 }
  0x9b   :  { %853 = vmatpush.bf16.msrb.mxu0 %v1177_v15  ;;  %880 = vmatpush.bf16.msrb.mxu2 %v1313_v46  ;;  %v1050_v15 = vld [vmem:[%s2219_s3 + $0x38] sm:$0xf0]  ;;  %v1364_v46 = vld [vmem:[%s2219_s3 + $0x14] sm:$0xf] }
  0x9c   :  { %869 = vmatpush.bf16.msrb.mxu1 %v1225_v45  ;;  %893 = vmatpush.bf16.msrb.mxu3 %v1069_v51  ;;  %v1053_v16 = vor.u32 %v1368_v12, %v1050_v15  ;;  %v1037_v48 = vor.u32 %v1364_v46, %v1034_v47  ;;  %v1386_v51 = vld [vmem:[%s2219_s3 + $0xc4] sm:$0xf]  ;;  %v1380_v15 = vld [vmem:[%s2219_s3 + $0x94] sm:$0xf] }
  0x9d   :  { %v1398_v12 = vld [vmem:[%s2219_s3 + $0x124] sm:$0xf]  ;;  %v1101_v18 = vor.u32 %v1380_v15, %v1098_v23 }
  0x9e   :  { %v1438_v23 = vld [vmem:[%s2219_s3 + $0x264] sm:$0xf] }
  0x9f   :  { %854 = vmatpush.bf16.msrb.mxu0 %v1169_v28  ;;  %881 = vmatpush.bf16.msrb.mxu2 %v1305_v61  ;;  %v1042_v28 = vld [vmem:[%s2219_s3 + $0x28] sm:$0xf0] }
  0xa0   :  { %870 = vmatpush.bf16.msrb.mxu1 %v1217_v60  ;;  %894 = vmatpush.bf16.msrb.mxu3 %v1061_v4  ;;  %v1045_v32 = vor.u32 %v1366_v27, %v1042_v28  ;;  %v1117_v4 = vor.u32 %v1384_v0, %v1114_v62 }
  0xa3   :  { %855 = vmatpush.bf16.msrb.mxu0 %v1161_v41  ;;  %882 = vmatpush.bf16.msrb.mxu2 %v1297_v24  ;;  %v1280_v41 = vld [vmem:[%s2219_s3 + $0x200] sm:$0xf] }
  0xa4   :  { %919 = vmatpush.bf16.msra.mxu1 %v1213_v9  ;;  %895 = vmatpush.bf16.msrb.mxu3 %v1053_v16  ;;  %v1281_v45 = vor.u32 %v1427_v42, %v1280_v41  ;;  %v1382_v9 = vld [vmem:[%s2219_s3 + $0xa4] sm:$0xf] }
  0xa5   :  { %v1109_v11 = vor.u32 %v1382_v9, %v1106_v10 }
  0xa7   :  { %856 = vmatpush.bf16.msrb.mxu0 %v1153_v55  ;;  %883 = vmatpush.bf16.msrb.mxu2 %v1289_v31  ;;  %v1125_v55 = vor.u32 %v1386_v51, %v1122_v52  ;;  %v1378_v31 = vld [vmem:[%s2219_s3 + $0x84] sm:$0xf]  ;;  %v1266_v51 = vld [vmem:[%s2219_s3 + $0x1e8] sm:$0xf0]  ;;  %v1440_v52 = vld [vmem:[%s2219_s3 + $0x274] sm:$0xf] }
  0xa8   :  { %920 = vmatpush.bf16.msra.mxu1 %v1205_v22  ;;  %896 = vmatpush.bf16.msrb.mxu3 %v1045_v32  ;;  %v1090_v32 = vld [vmem:[%s2219_s3 + $0x88] sm:$0xf0] }
  0xa9   :  { %v1093_v34 = vor.u32 %v1378_v31, %v1090_v32  ;;  %v1416_v31 = vld [vmem:[%s2219_s3 + $0x1b4] sm:$0xf]  ;;  %v1242_v32 = vld [vmem:[%s2219_s3 + $0x1b8] sm:$0xf0] }
  0xab   :  { %905 = vmatpush.bf16.msra.mxu0 %v1149_v8  ;;  %884 = vmatpush.bf16.msrb.mxu2 %v1281_v45  ;;  %v1422_v45 = vld [vmem:[%s2219_s3 + $0x1e4] sm:$0xf] }
  0xac   :  { %921 = vmatpush.bf16.msra.mxu1 %v1197_v38  ;;  %897 = vmatpush.bf16.msrb.mxu3 %v1037_v48  ;;  %v1274_v38 = vld [vmem:[%s2219_s3 + $0x1f8] sm:$0xf0] }
  0xaf   :  { %906 = vmatpush.bf16.msra.mxu0 %v1141_v21 }
  0xb0   :  { %922 = vmatpush.bf16.msra.mxu1 %v1189_v57  ;;  %v1338_v57 = vld [vmem:[%s2219_s3 + $0x278] sm:$0xf0] }
  0xb1   :  { %v1341_v5 = vor.u32 %v1440_v52, %v1338_v57 }
  0xb3   :  { %907 = vmatpush.bf16.msra.mxu0 %v1133_v37  ;;  %v1424_v37 = vld [vmem:[%s2219_s3 + $0x1f4] sm:$0xf] }
  0xb4   :  { %923 = vmatpush.bf16.msra.mxu1 %v1181_v6  ;;  %v1277_v47 = vor.u32 %v1424_v37, %v1274_v38  ;;  %v1414_v38 = vld [vmem:[%s2219_s3 + $0x1a4] sm:$0xf] }
  0xb7   :  { %908 = vmatpush.bf16.msra.mxu0 %v1125_v55 }
  0xbb   :  { %909 = vmatpush.bf16.msra.mxu0 %v1117_v4  ;;  %v1269_v4 = vor.u32 %v1422_v45, %v1266_v51  ;;  %v1412_v45 = vld [vmem:[%s2219_s3 + $0x194] sm:$0xf] }
  0xbf   :  { %910 = vmatpush.bf16.msra.mxu0 %v1109_v11 }
  0xc3   :  { %911 = vmatpush.bf16.msra.mxu0 %v1101_v18 }
  0xc7   :  { %912 = vmatpush.bf16.msra.mxu0 %v1093_v34 }
 0x106   :  { %v229_v59 = vpop.f32.mrf.mxu0  ;;  %v248_v1 = vpop.f32.mrf.mxu1 }
 0x107   :  { %v230_v2 = vadd.f32 %v229_v59, %v1891_v49  ;;  %v249_v3 = vadd.f32 %v248_v1, %v1893_v50  ;;  %v1026_v59 = vld [vmem:[%s2219_s3 + $0x8] sm:$0xf0] }
 0x108   :  { %v1029_v61 = vor.u32 %v1362_v58, %v1026_v59 }
 0x109   :  { %v258_v13 = vmax.f32 %v230_v2, 0.0  ;;  %v259_v14 = vmax.f32 %v249_v3, 0.0 }
 0x10a   :  { %898 = vmatpush.bf16.msrb.mxu3 %v1029_v61 }
 0x10b   :  { %v266_v20 = vmax.f32 %v258_v13, %v259_v14  ;;  %v1170_v13 = vld [vmem:[%s2219_s3 + $0x128] sm:$0xf0] }
 0x10c   :  { %v1173_v24 = vor.u32 %v1398_v12, %v1170_v13 }
 0x10d   :  { %270 = vst [vmem:[#allocation2] sm:$0xff] %v266_v20  ;;  %v1162_v20 = vld [vmem:[%s2219_s3 + $0x118] sm:$0xf0] }
 0x10e   :  { %v231_v35 = vpop.f32.mrf.mxu0  ;;  %v250_v36 = vpop.f32.mrf.mxu1  ;;  %924 = vmatpush.bf16.msra.mxu1 %v1173_v24  ;;  %v1165_v25 = vor.u32 %v1396_v19, %v1162_v20  ;;  %v1258_v24 = vld [vmem:[%s2219_s3 + $0x1d8] sm:$0xf0]  ;;  %v1418_v19 = vld [vmem:[%s2219_s3 + $0x1c4] sm:$0xf]  ;;  %v1250_v20 = vld [vmem:[%s2219_s3 + $0x1c8] sm:$0xf0] }
 0x10f   :  { %v232_v39 = vadd.f32 %v231_v35, %v1891_v49  ;;  %v251_v40 = vadd.f32 %v250_v36, %v1893_v50 }
 0x111   :  { %v260_v43 = vmax.f32 %v232_v39, 0.0  ;;  %v261_v44 = vmax.f32 %v251_v40, 0.0 }
 0x112   :  { %925 = vmatpush.bf16.msra.mxu1 %v1165_v25 }
 0x113   :  { %v267_v54 = vmax.f32 %v260_v43, %v261_v44  ;;  %v1428_v43 = vld [vmem:[%s2219_s3 + $0x214] sm:$0xf] }
 0x115   :  { %271 = vst [vmem:[#allocation2 + $0x8] sm:$0xff] %v267_v54 }
 0x116   :  { %v234_v1 = vpop.f32.mrf.mxu0  ;;  %v253_v60 = vpop.f32.mrf.mxu1 }
 0x117   :  { %v235_v2 = vadd.f32 %v234_v1, %v1891_v49  ;;  %v254_v3 = vadd.f32 %v253_v60, %v1893_v50 }
 0x119   :  { %v262_v7 = vmax.f32 %v235_v2, 0.0  ;;  %v263_v8 = vmax.f32 %v254_v3, 0.0 }
 0x11b   :  { %v268_v14 = vmax.f32 %v262_v7, %v263_v8 }
 0x11c   :  { %v274_v28 = vld [vmem:[#allocation2] ss:$2 sm:$0xff]  ;;  %v278_v29 = vld [vmem:[#allocation2 + $0x1] ss:$2 sm:$0xff] }
 0x11d   :  { %272 = vst [vmem:[#allocation2 + $0x10] sm:$0xff] %v268_v14  ;;  %v281_v33 = vmax.f32 %v274_v28, %v278_v29  ;;  %v1420_v14 = vld [vmem:[%s2219_s3 + $0x1d4] sm:$0xf] }
 0x11e   :  { %v236_v16 = vpop.f32.mrf.mxu0  ;;  %v255_v17 = vpop.f32.mrf.mxu1 }
 0x11f   :  { %v237_v21 = vadd.f32 %v236_v16, %v1891_v49  ;;  %v256_v22 = vadd.f32 %v255_v17, %v1893_v50  ;;  %v1394_v49 = vld [vmem:[%s2219_s3 + $0x104] sm:$0xf]  ;;  %v1154_v50 = vld [vmem:[%s2219_s3 + $0x108] sm:$0xf0]  ;;  %v285_v36 = vrot.slane %v281_v33, 6  ;;  %v1261_v17 = vor.u32 %v1420_v14, %v1258_v24 }
 0x120   :  { %v1157_v35 = vor.u32 %v1394_v49, %v1154_v50  ;;  %v1330_v16 = vld [vmem:[%s2219_s3 + $0x268] sm:$0xf0]  ;;  %v1434_v49 = vld [vmem:[%s2219_s3 + $0x244] sm:$0xf] }
 0x121   :  { %v264_v26 = vmax.f32 %v237_v21, 0.0  ;;  %v265_v27 = vmax.f32 %v256_v22, 0.0  ;;  %v2072_v41 = vsel %vm289_vm9, 0.0, %v285_v36  ;;  %v2080_v44 = vsel %vm289_vm9, %v285_v36, 0.0  ;;  %v1436_v21 = vld [vmem:[%s2219_s3 + $0x254] sm:$0xf] }
 0x122   :  { %926 = vmatpush.bf16.msra.mxu1 %v1157_v35  ;;  %v298_v48 = vrot.slane %v2072_v41, 1  ;;  %v299_v53 = vrot.slane %v2080_v44, 1  ;;  %v306_v54 = vrot.slane %v2072_v41, 2  ;;  %v307_v55 = vrot.slane %v2080_v44, 2  ;;  %v1322_v22 = vld [vmem:[%s2219_s3 + $0x258] sm:$0xf0] }
 0x123   :  { %v269_v30 = vmax.f32 %v264_v26, %v265_v27  ;;  %v314_v56 = vrot.slane %v2072_v41, 3  ;;  %v315_v60 = vrot.slane %v2080_v44, 3  ;;  %v1333_v18 = vor.u32 %v1438_v23, %v1330_v16  ;;  %v1314_v50 = vld [vmem:[%s2219_s3 + $0x248] sm:$0xf0] }
 0x124   :  { %v300_v6 = vsel %vm33_vm0, %v298_v48, %v299_v53  ;;  %v308_v8 = vsel %vm44_vm2, %v306_v54, %v307_v55  ;;  %v1253_v27 = vor.u32 %v1418_v19, %v1250_v20  ;;  %v322_v28 = vrot.slane %v2072_v41, 4  ;;  %v1306_v41 = vld [vmem:[%s2219_s3 + $0x238] sm:$0xf0]  ;;  %v1298_v48 = vld [vmem:[%s2219_s3 + $0x228] sm:$0xf0] }
 0x125   :  { %273 = vst [vmem:[#allocation2 + $0x18] sm:$0xff] %v269_v30  ;;  %v316_v12 = vsel %vm55_vm1, %v314_v56, %v315_v60  ;;  %v323_v29 = vrot.slane %v2080_v44, 4  ;;  %v1325_v30 = vor.u32 %v1436_v21, %v1322_v22  ;;  %v1245_v35 = vor.u32 %v1416_v31, %v1242_v32  ;;  %v1410_v53 = vld [vmem:[%s2219_s3 + $0x184] sm:$0xf]  ;;  %v1218_v54 = vld [vmem:[%s2219_s3 + $0x188] sm:$0xf0] }
 0x126   :  { %v1317_v37 = vor.u32 %v1434_v49, %v1314_v50  ;;  %v1290_v55 = vld [vmem:[%s2219_s3 + $0x218] sm:$0xf0]  ;;  %v1221_v56 = vor.u32 %v1410_v53, %v1218_v54 }
 0x127   :  { %v324_v34 = vsel %vm66_vm3, %v322_v28, %v323_v29  ;;  %v1293_v57 = vor.u32 %v1428_v43, %v1290_v55 }
 0x12c   :  { %v276_v39 = vld [vmem:[#allocation2 + $0x10] ss:$2 sm:$0xff]  ;;  %v280_v40 = vld [vmem:[#allocation2 + $0x11] ss:$2 sm:$0xff] }
 0x12d   :  { %v282_v42 = vmax.f32 %v276_v39, %v280_v40  ;;  %v1234_v39 = vld [vmem:[%s2219_s3 + $0x1a8] sm:$0xf0]  ;;  %v1432_v40 = vld [vmem:[%s2219_s3 + $0x234] sm:$0xf] }
 0x12e   :  { %v1309_v44 = vor.u32 %v1432_v40, %v1306_v41 }
 0x12f   :  { %v286_v46 = vrot.slane %v282_v42, 6  ;;  %v1237_v42 = vor.u32 %v1414_v38, %v1234_v39 }
 0x131   :  { %v2102_v58 = vpack.c.bf16 %v286_v46, %v285_v36  ;;  %v291_v59 = vsel %vm289_vm9, 0.0, %v286_v46  ;;  %v293_v1 = vsel %vm289_vm9, %v286_v46, 0.0  ;;  %v1226_v46 = vld [vmem:[%s2219_s3 + $0x198] sm:$0xf0] }
 0x132   :  { %v301_v61 = vrot.slane %v291_v59, 1  ;;  %v302_v0 = vrot.slane %v293_v1, 1  ;;  %v309_v62 = vrot.slane %v291_v59, 2  ;;  %v310_v63 = vrot.slane %v293_v1, 2 }
 0x133   :  { %1346 = vmatmul.msk.bf16.vlgmr.msra.gmra.mxu2 %vm1344_vm11, %v2102_v58  ;;  %v317_v2 = vrot.slane %v291_v59, 3  ;;  %v318_v3 = vrot.slane %v293_v1, 3  ;;  %v325_v25 = vrot.slane %v291_v59, 4  ;;  %v326_v26 = vrot.slane %v293_v1, 4  ;;  %v1282_v59 = vld [vmem:[%s2219_s3 + $0x208] sm:$0xf0] }
 0x134   :  { %933 = vmatpush.bf16.msra.mxu2 %v1277_v47  ;;  %v303_v7 = vsel %vm33_vm0, %v301_v61, %v302_v0  ;;  %v311_v9 = vsel %vm44_vm2, %v309_v62, %v310_v63  ;;  %v1430_v47 = vld [vmem:[%s2219_s3 + $0x224] sm:$0xf]  ;;  %v1229_v51 = vor.u32 %v1412_v45, %v1226_v46 }
 0x135   :  { %v331_v10 = vpack.c.bf16 %v303_v7, %v300_v6  ;;  %v332_v11 = vpack.c.bf16 %v311_v9, %v308_v8  ;;  %v319_v13 = vsel %vm55_vm1, %v317_v2, %v318_v3  ;;  %v327_v33 = vsel %vm66_vm3, %v325_v25, %v326_v26 }
 0x136   :  { %v2125_v15 = vpack.c.bf16 %v319_v13, %v316_v12  ;;  %v334_v36 = vpack.c.bf16 %v327_v33, %v324_v34  ;;  %v1301_v52 = vor.u32 %v1430_v47, %v1298_v48 }
 0x137   :  { %843 = vmatmul.bf16.vlgmr.msra.gmra.mxu3 %v331_v10  ;;  %857 = vmatmul.bf16.vlgmr.msrb.gmra.mxu0 %v332_v11 }
 0x138   :  { %871 = vmatmul.bf16.vlgmr.msrb.gmra.mxu1 %v2125_v15  ;;  %934 = vmatpush.bf16.msra.mxu2 %v1269_v4  ;;  %v415_v4 = vld [vmem:[%s2221_s4] sm:$0x3] }
 0x139   :  { %947 = vmatpush.bf16.msra.mxu3 %v1341_v5  ;;  %v417_v6 = vperm.slane %v415_v4, 0  ;;  %v418_v9 = vperm.slane %v415_v4, 1 }
 0x13c   :  { %935 = vmatpush.bf16.msra.mxu2 %v1261_v17 }
 0x13d   :  { %948 = vmatpush.bf16.msra.mxu3 %v1333_v18 }
 0x140   :  { %936 = vmatpush.bf16.msra.mxu2 %v1253_v27 }
 0x141   :  { %949 = vmatpush.bf16.msra.mxu3 %v1325_v30 }
 0x143   :  { %885 = vmatmul.bf16.vlgmr.msrb.gmra.mxu2 %v334_v36 }
 0x144   :  { %937 = vmatpush.bf16.msra.mxu2 %v1245_v35 }
 0x145   :  { %950 = vmatpush.bf16.msra.mxu3 %v1317_v37 }
 0x147   :  { %1351 = vmatmul.msk.bf16.vlgmr.msrb.gmra.mxu3 %vm1344_vm11, %v2102_v58  ;;  %913 = vmatmul.bf16.vlgmr.msra.gmra.mxu0 %v331_v10  ;;  %v1426_v58 = vld [vmem:[%s2219_s3 + $0x204] sm:$0xf] }
 0x148   :  { %927 = vmatmul.bf16.vlgmr.msra.gmra.mxu1 %v332_v11  ;;  %938 = vmatpush.bf16.msra.mxu2 %v1237_v42  ;;  %v1285_v1 = vor.u32 %v1426_v58, %v1282_v59 }
 0x149   :  { %951 = vmatpush.bf16.msra.mxu3 %v1309_v44 }
 0x14c   :  { %939 = vmatpush.bf16.msra.mxu2 %v1229_v51 }
 0x14d   :  { %952 = vmatpush.bf16.msra.mxu3 %v1301_v52 }
 0x150   :  { %940 = vmatpush.bf16.msra.mxu2 %v1221_v56 }
 0x151   :  { %953 = vmatpush.bf16.msra.mxu3 %v1293_v57 }
 0x153   :  { %941 = vmatmul.bf16.vlgmr.msra.gmra.mxu2 %v2125_v15 }
 0x155   :  { %954 = vmatpush.bf16.msra.mxu3 %v1285_v1 }
 0x158   :  { %955 = vmatmul.bf16.vlgmr.msra.gmra.mxu3 %v334_v36 }
 0x1b4   :  { %v858_v0 = vpop.f32.mrf.mxu0 }
 0x1b5   :  { %v872_v63 = vpop.f32.mrf.mxu1 }
 0x1b6   :  { %v830_v60 = vpop.f32.mrf.mxu2 }
 0x1b7   :  { %v831_v10 = vadd.f32 %v830_v60, %v417_v6 }
 0x1ba   :  { %v844_v61 = vpop.f32.mrf.mxu3 }
 0x1bb   :  { %v845_v12 = vadd.f32 %v844_v61, %v831_v10 }
 0x1bc   :  { %v860_v5 = vpop.f32.mrf.mxu0 }
 0x1bd   :  { %v874_v8 = vpop.f32.mrf.mxu1  ;;  %v859_v15 = vadd.f32 %v858_v0, %v845_v12 }
 0x1be   :  { %v832_v62 = vpop.f32.mrf.mxu2 }
 0x1bf   :  { %v833_v17 = vadd.f32 %v832_v62, %v417_v6  ;;  %v873_v20 = vadd.f32 %v872_v63, %v859_v15 }
 0x1c2   :  { %v846_v2 = vpop.f32.mrf.mxu3 }
 0x1c3   :  { %v847_v19 = vadd.f32 %v846_v2, %v833_v17 }
 0x1c4   :  { %v914_v14 = vpop.f32.mrf.mxu0 }
 0x1c5   :  { %v928_v16 = vpop.f32.mrf.mxu1  ;;  %v861_v29 = vadd.f32 %v860_v5, %v847_v19 }
 0x1c6   :  { %v886_v3 = vpop.f32.mrf.mxu2 }
 0x1c7   :  { %v887_v25 = vadd.f32 %v886_v3, %v873_v20  ;;  %v875_v34 = vadd.f32 %v874_v8, %v861_v29 }
 0x1c9   :  { %v961_v32 = vmax.f32 %v887_v25, 0.0 }
 0x1ca   :  { %v900_v7 = vpop.f32.mrf.mxu3 }
 0x1cb   :  { %v901_v13 = vadd.f32 %v900_v7, %v418_v9 }
 0x1cc   :  { %v916_v27 = vpop.f32.mrf.mxu0 }
 0x1cd   :  { %v915_v23 = vadd.f32 %v914_v14, %v901_v13  ;;  %v930_v49 = vpop.f32.mrf.mxu1 }
 0x1ce   :  { %v888_v11 = vpop.f32.mrf.mxu2 }
 0x1cf   :  { %v929_v22 = vadd.f32 %v928_v16, %v915_v23  ;;  %v889_v37 = vadd.f32 %v888_v11, %v875_v34 }
 0x1d1   :  { %v963_v41 = vmax.f32 %v889_v37, 0.0 }
 0x1d2   :  { %v902_v24 = vpop.f32.mrf.mxu3 }
 0x1d3   :  { %v903_v21 = vadd.f32 %v902_v24, %v418_v9 }
 0x1d5   :  { %v917_v30 = vadd.f32 %v916_v27, %v903_v21 }
 0x1d6   :  { %v942_v18 = vpop.f32.mrf.mxu2 }
 0x1d7   :  { %v943_v26 = vadd.f32 %v942_v18, %v929_v22  ;;  %v931_v36 = vadd.f32 %v930_v49, %v917_v30 }
 0x1db   :  { %v956_v28 = vpop.f32.mrf.mxu3 }
 0x1dc   :  { %v957_v31 = vadd.f32 %v956_v28, %v943_v26 }
 0x1de   :  { %v962_v33 = vmax.f32 %v957_v31, 0.0  ;;  %v944_v50 = vpop.f32.mrf.mxu2 }
 0x1df   :  { %v945_v38 = vadd.f32 %v944_v50, %v931_v36 }
 0x1e0   :  { %v965_v35 = vmax.f32 %v961_v32, %v962_v33 }
 0x1e2   :  { %967 = vst [vmem:[#allocation3] sm:$0xff] %v965_v35 }
 0x1e3   :  { %v958_v39 = vpop.f32.mrf.mxu3 }
 0x1e4   :  { %v959_v40 = vadd.f32 %v958_v39, %v945_v38 }
 0x1e6   :  { %v964_v42 = vmax.f32 %v959_v40, 0.0 }
 0x1e8   :  { %v966_v44 = vmax.f32 %v963_v41, %v964_v42 }
 0x1ea   :  { %968 = vst [vmem:[#allocation3 + $0x8] sm:$0xff] %v966_v44 }
 0x1f1   :  { %v969_v45 = vld [vmem:[#allocation3] ss:$2 sm:$0xff]  ;;  %v971_v46 = vld [vmem:[#allocation3 + $0x1] ss:$2 sm:$0xff] }
 0x1f2   :  { %v972_v47 = vmax.f32 %v969_v45, %v971_v46 }
 0x1f4   :  { %973 = vst [vmem:[%s2222_s5] sm:$0xff] %v972_v47 }

</bundles_post_ra>
